<compile_context>
chip_gen: v7x
topology: tpu7x:2x2x1
jax: 0.10.0
libtpu: 0.0.40
codegen_flags: <defaults>
</compile_context>

<pallas_src>
import jax
import jax.numpy as jnp
from jax.experimental import pallas as pl
from jax.experimental.pallas import tpu as pltpu


def _round_up(n, m):
    return ((n + m - 1) // m) * m


def _mlp_kernel(x_ref, w1_ref, b1_ref, w2_ref, b2_ref, w3_ref, b3_ref, o_ref):
    # In-kernel cast: x arrives f32 from HBM, cast to bf16 on the VPU (free vs. an
    # extra wrapper-side HBM pass).
    xb = x_ref[...].astype(jnp.bfloat16)

    # fc1: bf16 MXU matmul, f32 accumulate; bias + ReLU in f32.
    h1 = jnp.dot(xb, w1_ref[...], preferred_element_type=jnp.float32)
    h1 = jnp.maximum(h1 + b1_ref[...], 0.0)
    # TODO(synk): nn.Dropout(0.1) is identity in eval mode; training-mode dropout
    # (pltpu.prng_random_bits masking) intentionally omitted.

    # fc2: bf16 MXU matmul, f32 accumulate; bias + ReLU in f32.
    h2 = jnp.dot(h1.astype(jnp.bfloat16), w2_ref[...],
                 preferred_element_type=jnp.float32)
    h2 = jnp.maximum(h2 + b2_ref[...], 0.0)

    # fc3: lane-dense formulation.  w3 is stored as (1, 64) [out, in]; contracting the
    # hidden axis of both operands yields a (1, TB) slab (batch on the lane axis).
    # This is the same dimension_numbers pl.dot(w3, h2, trans_b=True) would emit, but
    # keeps explicit f32 accumulation.
    out = jax.lax.dot_general(
        w3_ref[...], h2.astype(jnp.bfloat16),
        dimension_numbers=(((1,), (1,)), ((), ())),
        preferred_element_type=jnp.float32)
    o_ref[...] = out + b3_ref[0]  # scalar bias from SMEM


def link_predictor_forward(x, params, *, tb=8192):
    """x: [B, D] float32.  params: dict of w1,b1,w2,b2,w3,b3 (see init_params /
    prepare_params; weights ideally already bf16)."""
    B, D = x.shape

    # --- Batch tile selection -------------------------------------------------
    Bp128 = _round_up(B, 128)
    TB = min(_round_up(tb, 128), Bp128)
    # v7x has 2 TensorCores: keep >=2 tiles when the batch allows so the "parallel"
    # grid axis feeds both.  Harmless (tiny extra per-step overhead) on v5e/v6e.
    if Bp128 >= 2 * 128 and Bp128 // TB < 2:
        TB = max(128, ((Bp128 // 2) // 128) * 128)
    Bp = _round_up(B, TB)
    num_tiles = Bp // TB

    # Pad batch (f32, no dtype change here -- cast happens inside the kernel).
    xp = x if Bp == B else jnp.pad(x, ((0, Bp - B), (0, 0)))

    # Weights: expected pre-converted to bf16 once (prepare_params).  The checks below
    # are static-dtype fallbacks only; no per-call cast when params are prepared.
    w1, w2, w3 = params["w1"], params["w2"], params["w3"]
    if w1.dtype != jnp.bfloat16:
        w1 = w1.astype(jnp.bfloat16)
    if w2.dtype != jnp.bfloat16:
        w2 = w2.astype(jnp.bfloat16)
    if w3.dtype != jnp.bfloat16:
        w3 = w3.astype(jnpo_bf16) if False else w3.astype(jnp.bfloat16)
    b1, b2, b3 = params["b1"], params["b2"], params["b3"]

    # --- VMEM budget (sized against v7x's 64 MiB physical VMEM) ---------------
    # Per-step live set ~ TB*(x f32+bf16 dbl-buf + h1 f32/bf16 + h2 f32/bf16 + out).
    live_bytes = TB * (10 * D + 1164) + (1 << 20)
    vmem_limit = int(min(56 * 1024 * 1024, max(32 * 1024 * 1024, 2 * live_bytes)))

    # Advisory cost for XLA's scheduler.
    flops = 2 * Bp * (D * 128 + 128 * 64 + 64)
    bytes_accessed = Bp * (4 * D + 4) + 2 * (D * 128 + 128 * 64 + 64) + 4 * (128 + 64 + 1)
    cost = pl.CostEstimate(flops=flops, transcendentals=0,
                           bytes_accessed=bytes_accessed)

    const = lambda shape: pl.BlockSpec(shape, lambda i: (0, 0))  # VMEM-resident weights

    out = pl.pallas_call(
        _mlp_kernel,
        out_shape=jax.ShapeDtypeStruct((1, Bp), jnp.float32),
        grid=(num_tiles,),
        in_specs=[
            pl.BlockSpec((TB, D), lambda i: (i, 0)),   # x tile (f32), pipelined
            const(w1.shape),                           # (D, 128) bf16
            const(b1.shape),                           # (1, 128) f32
            const(w2.shape),                           # (128, 64) bf16
            const(b2.shape),                           # (1, 64) f32
            const(w3.shape),                           # (1, 64) bf16
            pl.BlockSpec(memory_space=pltpu.MemorySpace.SMEM),  # b3 scalar
        ],
        out_specs=pl.BlockSpec((1, TB), lambda i: (0, i)),
        compiler_params=pltpu.CompilerParams(
            # Batch axis is embarrassingly parallel -> v7x can shard across its 2 TCs.
            dimension_semantics=("parallel",),
            vmem_limit_bytes=vmem_limit,
        ),
        cost_estimate=cost,
    )(xp, w1, b1, w2, b2, w3, b3)

    # Lane-dense (1, Bp) slab -> [B, 1]; drop padded rows.
    return out[0, :B].reshape(B, 1)


def init_params(key, input_size):
    """Deterministic f32 master params mimicking nn.Linear.
    w1/w2 stored [in, out]; w3 stored [1, 64] (= PyTorch's [out, in]) so the kernel can
    contract the hidden axis directly for a lane-dense output.  b3 is a (1,) scalar."""
    k1, k2, k3, k4, k5, k6 = jax.random.split(key, 6)

    def lin(kw, kb, fan_in, w_shape, b_shape):
        bound = 1.0 / jnp.sqrt(fan_in)
        w = jax.random.uniform(kw, w_shape, jnp.float32, -bound, bound)
        b = jax.random.uniform(kb, b_shape, jnp.float32, -bound, bound)
        return w, b

    w1, b1 = lin(k1, k2, input_size, (input_size, 128), (1, 128))
    w2, b2 = lin(k3, k4, 128, (128, 64), (1, 64))
    w3, b3 = lin(k5, k6, 64, (1, 64), (1,))
    return {"w1": w1, "b1": b1, "w2": w2, "b2": b2, "w3": w3, "b3": b3}


def prepare_params(params):
    """One-time conversion of weights to bf16 for the inference hot path.
    Biases stay f32 (bias-add / ReLU done in f32 on the VPU)."""
    return {
        "w1": params["w1"].astype(jnp.bfloat16),
        "w2": params["w2"].astype(jnp.bfloat16),
        "w3": params["w3"].astype(jnp.bfloat16),
        "b1": params["b1"],
        "b2": params["b2"],
        "b3": params["b3"],
    }


if __name__ == "__main__":
    key = jax.random.PRNGKey(0)
    kx, kp = jax.random.split(key)

    input_size = 32
    batch = 8
    x = jax.random.normal(kx, (batch, input_size), dtype=jnp.float32)
    params = init_params(kp, input_size)          # f32 master copy (for references)
    inf_params = prepare_params(params)           # bf16 weights, converted ONCE

    out = jax.block_until_ready(link_predictor_forward(x, inf_params))
    assert out.shape == (batch, 1)

    # Reference 1: same bf16-weight / bf16-x / f32-accumulate math in plain JAX.
    xb = x.astype(jnp.bfloat16)
    w1b = params["w1"].astype(jnp.bfloat16)
    w2b = params["w2"].astype(jnp.bfloat16)
    w3b = params["w3"].astype(jnp.bfloat16)
    h1 = jnp.maximum(
        jnp.dot(xb, w1b, preferred_element_type=jnp.float32) + params["b1"], 0.0)
    h2 = jnp.maximum(
        jnp.dot(h1.astype(jnp.bfloat16), w2b, preferred_element_type=jnp.float32)
        + params["b2"], 0.0)
    ref_bf16 = (jnp.dot(h2.astype(jnp.bfloat16), w3b.T,
                        preferred_element_type=jnp.float32) + params["b3"])
    assert jnp.allclose(out, ref_bf16, atol=1e-3, rtol=1e-3)

    # Reference 2: full-f32 math (loose tolerance; bf16 path costs ~1e-2 rel).
    r1 = jnp.maximum(x @ params["w1"] + params["b1"], 0.0)
    r2 = jnp.maximum(r1 @ params["w2"] + params["b2"], 0.0)
    ref_f32 = r2 @ params["w3"].T + params["b3"]
    assert jnp.allclose(out, ref_f32, atol=1e-1, rtol=1e-1)

    print("KERNEL_OK")
</pallas_src>

<mosaic_0001>
module attributes {stable_mosaic.version = 11 : i64} {
  func.func @_mlp_kernel(%arg0: i32, %arg1: memref<128x32xf32, #tpu.memory_space<vmem>>, %arg2: memref<32x128xbf16, #tpu.memory_space<vmem>>, %arg3: memref<1x128xf32, #tpu.memory_space<vmem>>, %arg4: memref<128x64xbf16, #tpu.memory_space<vmem>>, %arg5: memref<1x64xf32, #tpu.memory_space<vmem>>, %arg6: memref<1x64xbf16, #tpu.memory_space<vmem>>, %arg7: memref<1xf32, #tpu.memory_space<smem>>, %arg8: memref<1x128xf32, #tpu.memory_space<vmem>>) attributes {dimension_semantics = [#tpu.dimension_semantics<parallel>], iteration_bounds = array<i64: 1>, scalar_prefetch = 0 : i64, scratch_operands = 0 : i64, tpu.core_type = #tpu.core_type<tc>, window_params = [{transform_indices = @transform_0, window_bounds = array<i64: 128, 32>}, {pipeline_mode = #tpu.pipeline_mode<synchronous>, transform_indices = @transform_1, window_bounds = array<i64: 32, 128>}, {pipeline_mode = #tpu.pipeline_mode<synchronous>, transform_indices = @transform_2, window_bounds = array<i64: 1, 128>}, {pipeline_mode = #tpu.pipeline_mode<synchronous>, transform_indices = @transform_3, window_bounds = array<i64: 128, 64>}, {pipeline_mode = #tpu.pipeline_mode<synchronous>, transform_indices = @transform_4, window_bounds = array<i64: 1, 64>}, {pipeline_mode = #tpu.pipeline_mode<synchronous>, transform_indices = @transform_5, window_bounds = array<i64: 1, 64>}, {transform_indices = @transform_6, window_bounds = array<i64: 1>}, {transform_indices = @transform_7, window_bounds = array<i64: 1, 128>}]} {
    %c0 = arith.constant 0 : index
    %c0_0 = arith.constant 0 : index
    %0 = vector.load %arg1[%c0, %c0_0] : memref<128x32xf32, #tpu.memory_space<vmem>>, vector<128x32xf32>
    %1 = arith.truncf %0 : vector<128x32xf32> to vector<128x32xbf16>
    %c0_1 = arith.constant 0 : index
    %c0_2 = arith.constant 0 : index
    %2 = vector.load %arg2[%c0_1, %c0_2] : memref<32x128xbf16, #tpu.memory_space<vmem>>, vector<32x128xbf16>
    %cst = arith.constant dense<0.000000e+00> : vector<128x128xf32>
    %3 = tpu.matmul %1, %2, %cst {dimension_numbers = #tpu.dot_dimension_numbers<[1], [0], [0], [1], [0, 0, 1, 1], [], []>} : vector<128x32xbf16>, vector<32x128xbf16>, vector<128x128xf32> -> vector<128x128xf32>
    %c0_3 = arith.constant 0 : index
    %c0_4 = arith.constant 0 : index
    %4 = vector.load %arg3[%c0_3, %c0_4] : memref<1x128xf32, #tpu.memory_space<vmem>>, vector<1x128xf32>
    %5 = vector.broadcast %4 : vector<1x128xf32> to vector<128x128xf32>
    %6 = arith.addf %3, %5 : vector<128x128xf32>
    %cst_5 = arith.constant 0.000000e+00 : f32
    %7 = vector.broadcast %cst_5 : f32 to vector<128x128xf32>
    %8 = arith.maximumf %6, %7 : vector<128x128xf32>
    %9 = arith.truncf %8 : vector<128x128xf32> to vector<128x128xbf16>
    %c0_6 = arith.constant 0 : index
    %c0_7 = arith.constant 0 : index
    %10 = vector.load %arg4[%c0_6, %c0_7] : memref<128x64xbf16, #tpu.memory_space<vmem>>, vector<128x64xbf16>
    %cst_8 = arith.constant dense<0.000000e+00> : vector<128x64xf32>
    %11 = tpu.matmul %9, %10, %cst_8 {dimension_numbers = #tpu.dot_dimension_numbers<[1], [0], [0], [1], [0, 0, 1, 1], [], []>} : vector<128x128xbf16>, vector<128x64xbf16>, vector<128x64xf32> -> vector<128x64xf32>
    %c0_9 = arith.constant 0 : index
    %c0_10 = arith.constant 0 : index
    %12 = vector.load %arg5[%c0_9, %c0_10] : memref<1x64xf32, #tpu.memory_space<vmem>>, vector<1x64xf32>
    %13 = vector.broadcast %12 : vector<1x64xf32> to vector<128x64xf32>
    %14 = arith.addf %11, %13 : vector<128x64xf32>
    %cst_11 = arith.constant 0.000000e+00 : f32
    %15 = vector.broadcast %cst_11 : f32 to vector<128x64xf32>
    %16 = arith.maximumf %14, %15 : vector<128x64xf32>
    %c0_12 = arith.constant 0 : index
    %c0_13 = arith.constant 0 : index
    %17 = vector.load %arg6[%c0_12, %c0_13] : memref<1x64xbf16, #tpu.memory_space<vmem>>, vector<1x64xbf16>
    %18 = arith.truncf %16 : vector<128x64xf32> to vector<128x64xbf16>
    %cst_14 = arith.constant dense<0.000000e+00> : vector<1x128xf32>
    %19 = tpu.matmul %17, %18, %cst_14 {dimension_numbers = #tpu.dot_dimension_numbers<[1], [1], [0], [0], [0, 0, 1, 0], [], []>} : vector<1x64xbf16>, vector<128x64xbf16>, vector<1x128xf32> -> vector<1x128xf32>
    %c0_15 = arith.constant 0 : index
    %20 = memref.load %arg7[%c0_15] : memref<1xf32, #tpu.memory_space<smem>>
    %21 = vector.broadcast %20 : f32 to vector<1x128xf32>
    %22 = arith.addf %19, %21 : vector<1x128xf32>
    %c0_16 = arith.constant 0 : index
    %c0_17 = arith.constant 0 : index
    %23 = vector.load %arg8[%c0_16, %c0_17] : memref<1x128xf32, #tpu.memory_space<vmem>>, vector<1x128xf32>
    tpu.vector_store %arg8[%c0_16, %c0_17], %22 {strides = array<i32>} : memref<1x128xf32, #tpu.memory_space<vmem>>, vector<1x128xf32>,
    return
  }
  func.func @transform_0(%arg0: i32) -> (i32, i32) {
    %c0_i32 = arith.constant 0 : i32
    %c0_i32_0 = arith.constant 0 : i32
    return %arg0, %c0_i32 : i32, i32
  }
  func.func @transform_1(%arg0: i32) -> (i32, i32) {
    %c0_i32 = arith.constant 0 : i32
    %c0_i32_0 = arith.constant 0 : i32
    %c0_i32_1 = arith.constant 0 : i32
    return %c0_i32, %c0_i32_0 : i32, i32
  }
  func.func @transform_2(%arg0: i32) -> (i32, i32) {
    %c0_i32 = arith.constant 0 : i32
    %c0_i32_0 = arith.constant 0 : i32
    %c0_i32_1 = arith.constant 0 : i32
    return %c0_i32, %c0_i32_0 : i32, i32
  }
  func.func @transform_3(%arg0: i32) -> (i32, i32) {
    %c0_i32 = arith.constant 0 : i32
    %c0_i32_0 = arith.constant 0 : i32
    %c0_i32_1 = arith.constant 0 : i32
    return %c0_i32, %c0_i32_0 : i32, i32
  }
  func.func @transform_4(%arg0: i32) -> (i32, i32) {
    %c0_i32 = arith.constant 0 : i32
    %c0_i32_0 = arith.constant 0 : i32
    %c0_i32_1 = arith.constant 0 : i32
    return %c0_i32, %c0_i32_0 : i32, i32
  }
  func.func @transform_5(%arg0: i32) -> (i32, i32) {
    %c0_i32 = arith.constant 0 : i32
    %c0_i32_0 = arith.constant 0 : i32
    %c0_i32_1 = arith.constant 0 : i32
    return %c0_i32, %c0_i32_0 : i32, i32
  }
  func.func @transform_6(%arg0: i32) -> i32 {
    %c0_i32 = arith.constant 0 : i32
    %c0_i32_0 = arith.constant 0 : i32
    return %c0_i32 : i32
  }
  func.func @transform_7(%arg0: i32) -> (i32, i32) {
    %c0_i32 = arith.constant 0 : i32
    %c0_i32_0 = arith.constant 0 : i32
    return %c0_i32, %arg0 : i32, i32
  }
}

</mosaic_0001>

<bundles_post_ra>
// kernel: tpu_custom_call.1
= control target key start
LH: loop header
LB: loop body
LE: loop exit
PB: predicated region body
PF: predicated region fallthrough
CT: control target
= control target key end

     0   :  { %vm76_vm0 = vcmask 261120   ;;  %s836_s0 = inlined_call_operand.vmem [shape: f32[128,32], index: 0, kind: input, shape index: {}]   ;;  %s837_s1 = inlined_call_operand.vmem [shape: bf16[32,128], index: 1, kind: input, shape index: {}]   ;;  %s838_s2 = inlined_call_operand.vmem [shape: f32[1,128], index: 2, kind: input, shape index: {}]   ;;  %s839_s3 = inlined_call_operand.vmem [shape: bf16[128,64], index: 3, kind: input, shape index: {}]   ;;  %s840_s4 = inlined_call_operand.vmem [shape: f32[1,64], index: 4, kind: input, shape index: {}]   ;;  %s841_s5 = inlined_call_operand.vmem [shape: bf16[1,64], index: 5, kind: input, shape index: {}]   ;;  %s842_s6 = inlined_call_operand.<no memory space> [shape: f32[1], index: 6, kind: input, shape index: {}]   ;;  %s843_s7 = inlined_call_operand.hbm [shape: f32[1,128], index: 7, kind: output, shape index: {}]  }
   0x1   :  { %v631_v0 = vld [vmem:[%s837_s1] sm:$0xff]   ;;  %v632_v1 = vld [vmem:[%s837_s1 + $0x8] sm:$0xff]   ;;  %v31_v5 = vld [vmem:[%s836_s0 + $0x10] sm:$0xff] }
   0x2   :  { %556 = vmatprep.subr.bf16.mxu1 %v631_v0  ;;  %v29_v2 = vld [vmem:[%s836_s0] sm:$0xff]  ;;  %v30_v3 = vld [vmem:[%s836_s0 + $0x8] sm:$0xff]  ;;  %v32_v6 = vld [vmem:[%s836_s0 + $0x18] sm:$0xff] }
   0x3   :  { %557 = vmatpush3.bf16.msra.mxu1 %v631_v0  ;;  %v45_v4 = vpack.c.bf16 %v30_v3, %v29_v2  ;;  %v33_v7 = vld [vmem:[%s836_s0 + $0x20] sm:$0xff]  ;;  %v34_v8 = vld [vmem:[%s836_s0 + $0x28] sm:$0xff]  ;;  %v46_v9 = vpack.c.bf16 %v32_v6, %v31_v5  ;;  %v35_v12 = vld [vmem:[%s836_s0 + $0x30] sm:$0xff] }
   0x4   :  { %558 = vmatprep.subr.bf16.mxu1 %v632_v1  ;;  %v47_v10 = vpack.c.bf16 %v34_v8, %v33_v7  ;;  %v633_v11 = vld [vmem:[%s839_s3] sm:$0xff]   ;;  %v36_v13 = vld [vmem:[%s836_s0 + $0x38] sm:$0xff]  ;;  %v634_v14 = vld [vmem:[%s839_s3 + $0x8] sm:$0xff]  }
   0x5   :  { %560 = vmatprep.mubr.msk.bf16.mxu1 %vm76_vm0, %v45_v4  ;;  %v37_v15 = vld [vmem:[%s836_s0 + $0x40] sm:$0xff]  ;;  %v38_v16 = vld [vmem:[%s836_s0 + $0x48] sm:$0xff]  ;;  %v635_v17 = vld [vmem:[%s839_s3 + $0x10] sm:$0xff]   ;;  %v48_v18 = vpack.c.bf16 %v36_v13, %v35_v12 }
   0x7   :  { %559 = vmatpush3.bf16.msra.mxu1 %v632_v1 }
   0x8   :  { %576 = vmatprep.subr.bf16.mxu1 %v633_v11 }
   0xa   :  { %561 = vmatmul.mubr.msk.bf16.vlgmr.msra.gmra.mrb[0].mxu1 %vm76_vm0, %v46_v9 }
   0xb   :  { %564 = vmatprep.mubr.msk.bf16.mxu1 %vm76_vm0, %v47_v10  ;;  %577 = vmatpush3.bf16.msra.mxu1 %v633_v11 }
   0xc   :  { %578 = vmatprep.subr.bf16.mxu1 %v634_v14 }
   0xd   :  { %13 = vsyncpa [#allocation4], 0  ;;  %v49_v19 = vpack.c.bf16 %v38_v16, %v37_v15  ;;  %v636_v20 = vld [vmem:[%s839_s3 + $0x18] sm:$0xff]   ;;  %v39_v21 = vld [vmem:[%s836_s0 + $0x50] sm:$0xff]  ;;  %vm666_vm1 = vmmov 0   ;;  %vm417_vm2 = vcmask 523264  }
   0xe   :  { %v40_v22 = vld [vmem:[%s836_s0 + $0x58] sm:$0xff]  ;;  %v41_v23 = vld [vmem:[%s836_s0 + $0x60] sm:$0xff]  ;;  %v42_v24 = vld [vmem:[%s836_s0 + $0x68] sm:$0xff]  ;;  %s667_s9 = smov [#allocation3]  }
   0xf   :  { %579 = vmatpush3.bf16.msra.mxu1 %v634_v14  ;;  %v637_v25 = vld [vmem:[%s839_s3 + $0x20] sm:$0xff]   ;;  %v50_v26 = vpack.c.bf16 %v40_v22, %v39_v21  ;;  %v51_v27 = vpack.c.bf16 %v42_v24, %v41_v23  ;;  %v638_v28 = vld [vmem:[%s839_s3 + $0x28] sm:$0xff]   ;;  %v43_v29 = vld [vmem:[%s836_s0 + $0x70] sm:$0xff]  ;;  %s492_s10 = sshll.u32 %s667_s9, 4  ;;  %s493_s10 = int_to_ptr.vmem [resolvable:$true] %s492_s10 }
  0x10   :  { %580 = vmatprep.subr.bf16.mxu1 %v635_v17  ;;  %v44_v30 = vld [vmem:[%s836_s0 + $0x78] sm:$0xff]  ;;  %v639_v32 = vld [vmem:[%s839_s3 + $0x30] sm:$0xff]   ;;  %v500_v34 = vld [vmem:[%s838_s2] ss:$0 sm:$0xff]  ;;  %s641_s11 = scalar_lea.vmem %s493_s10, 16  ;;  %s645_s12 = scalar_lea.vmem %s493_s10, 32 }
  0x11   :  { %v52_v31 = vpack.c.bf16 %v44_v30, %v43_v29  ;;  %v640_v33 = vld [vmem:[%s839_s3 + $0x38] sm:$0xff]   ;;  %p642_p0 = scmp.ne.s32.totalorder %s493_s10, %s641_s11  ;;  %p646_p1 = scmp.lt.s32.totalorder %s493_s10, %s493_s10 }
  0x12   :  { %565 = vmatmul.mubr.msk.bf16.gmra.mrb[4].mxu1 %vm76_vm0, %v48_v18  ;;  %p647_p2 = scmp.lt.s32.totalorder %s645_s12, %s641_s11 }
  0x13   :  { %568 = vmatprep.mubr.msk.bf16.mxu1 %vm76_vm0, %v49_v19  ;;  %581 = vmatpush3.bf16.msra.mxu1 %v635_v17 }
  0x14   :  { %582 = vmatprep.subr.bf16.mxu1 %v636_v20  ;;  %p648_p3 = por %p647_p2, %p646_p1 }
  0x16   :  { %p649_p4 = pnand %p648_p3, %p642_p0 }
  0x17   :  { %583 = vmatpush3.bf16.msra.mxu1 %v636_v20 }
  0x18   :  { %584 = vmatprep.subr.bf16.mxu1 %v637_v25 }
  0x1a   :  { %569 = vmatmul.mubr.msk.bf16.gmra.mrb[8].mxu1 %vm76_vm0, %v50_v26 }
  0x1b   :  { %572 = vmatprep.mubr.msk.bf16.mxu1 %vm76_vm0, %v51_v27  ;;  %585 = vmatpush3.bf16.msra.mxu1 %v637_v25  ;;  %v665_v27 = vmov 0.0  }
  0x1c   :  { %586 = vmatprep.subr.bf16.mxu1 %v638_v28  ;;  %608 = vmatprep.subr.bf16.mxu0 %v665_v27 }
  0x1d   :  { %624 = vmatprep.mubr.msk.bf16.mxu0 %vm666_vm1, %v665_v27 }
  0x1f   :  { %587 = vmatpush3.bf16.msra.mxu1 %v638_v28  ;;  %v511_v28 = vld [vmem:[%s840_s4] ss:$0 sm:$0xff] }
  0x20   :  { %588 = vmatprep.subr.bf16.mxu1 %v639_v32 }
  0x22   :  { %573 = vmatmul.mubr.msk.bf16.gmra.mrb[12].mxu1 %vm76_vm0, %v52_v31 }
  0x23   :  { %589 = vmatpush3.bf16.msra.mxu1 %v639_v32 }
  0x24   :  { %590 = vmatprep.subr.bf16.mxu1 %v640_v33 }
  0x27   :  { %591 = vmatpush3.bf16.msra.mxu1 %v640_v33 }
  0xdd   :  { %v562_v35 = vpop.f32.mrb[0].mxu1 }
  0xde   :  { %v144_v36 = vadd.f32 %v562_v35, %v500_v34  ;;  %v135_v37 = vpop.f32.mrb[1].mxu1 }
  0xdf   :  { %v136_v38 = vadd.f32 %v500_v34, %v135_v37  ;;  %v563_v39 = vpop.f32.mrb[2].mxu1 }
  0xe0   :  { %v147_v40 = vadd.f32 %v563_v39, %v500_v34  ;;  %v138_v41 = vpop.f32.mrb[3].mxu1  ;;  %v200_v43 = vmax.f32 %v144_v36, 0.0 }
  0xe1   :  { %v139_v42 = vadd.f32 %v500_v34, %v138_v41  ;;  %v198_v45 = vmax.f32 %v136_v38, 0.0 }
  0xe2   :  { %v201_v44 = vmax.f32 %v147_v40, 0.0 }
  0xe3   :  { %v199_v46 = vmax.f32 %v139_v42, 0.0 }
  0xe4   :  { %v215_v47 = vpack.c.bf16 %v201_v44, %v200_v43 }
  0xe5   :  { %v214_v48 = vpack.c.bf16 %v199_v46, %v198_v45  ;;  %v566_v49 = vpop.f32.mrb[4].mxu1 }
  0xe6   :  { %v160_v50 = vadd.f32 %v566_v49, %v500_v34  ;;  %v151_v51 = vpop.f32.mrb[5].mxu1 }
  0xe7   :  { %v152_v52 = vadd.f32 %v500_v34, %v151_v51  ;;  %592 = vmatprep.mubr.bf16.mxu1 %v214_v48  ;;  %v567_v53 = vpop.f32.mrb[6].mxu1 }
  0xe8   :  { %v204_v54 = vmax.f32 %v160_v50, 0.0  ;;  %v163_v55 = vadd.f32 %v567_v53, %v500_v34  ;;  %593 = vmatmul.mubr.bf16.vlgmr.msra.gmra.mrb[16].mxu1 %v215_v47  ;;  %v154_v56 = vpop.f32.mrb[7].mxu1 }
  0xe9   :  { %v202_v57 = vmax.f32 %v152_v52, 0.0  ;;  %v155_v58 = vadd.f32 %v500_v34, %v154_v56 }
  0xea   :  { %v205_v59 = vmax.f32 %v163_v55, 0.0 }
  0xeb   :  { %v203_v60 = vmax.f32 %v155_v58, 0.0 }
  0xec   :  { %v217_v61 = vpack.c.bf16 %v205_v59, %v204_v54 }
  0xed   :  { %v216_v62 = vpack.c.bf16 %v203_v60, %v202_v57  ;;  %v570_v63 = vpop.f32.mrb[8].mxu1 }
  0xee   :  { %v176_v0 = vadd.f32 %v570_v63, %v500_v34  ;;  %v167_v1 = vpop.f32.mrb[9].mxu1 }
  0xef   :  { %596 = vmatprep.mubr.bf16.mxu1 %v216_v62  ;;  %v168_v2 = vadd.f32 %v500_v34, %v167_v1  ;;  %v571_v3 = vpop.f32.mrb[10].mxu1 }
  0xf0   :  { %597 = vmatmul.mubr.bf16.gmra.mrb[20].mxu1 %v217_v61  ;;  %v208_v4 = vmax.f32 %v176_v0, 0.0  ;;  %v179_v5 = vadd.f32 %v571_v3, %v500_v34  ;;  %v170_v6 = vpop.f32.mrb[11].mxu1 }
  0xf1   :  { %v206_v7 = vmax.f32 %v168_v2, 0.0  ;;  %v171_v8 = vadd.f32 %v500_v34, %v170_v6 }
  0xf2   :  { %v209_v9 = vmax.f32 %v179_v5, 0.0 }
  0xf3   :  { %v207_v10 = vmax.f32 %v171_v8, 0.0 }
  0xf4   :  { %v219_v11 = vpack.c.bf16 %v209_v9, %v208_v4 }
  0xf5   :  { %v218_v12 = vpack.c.bf16 %v207_v10, %v206_v7  ;;  %v574_v13 = vpop.f32.mrb[12].mxu1 }
  0xf6   :  { %v192_v14 = vadd.f32 %v574_v13, %v500_v34  ;;  %v183_v15 = vpop.f32.mrb[13].mxu1 }
  0xf7   :  { %600 = vmatprep.mubr.bf16.mxu1 %v218_v12  ;;  %v184_v16 = vadd.f32 %v500_v34, %v183_v15  ;;  %v575_v17 = vpop.f32.mrb[14].mxu1 }
  0xf8   :  { %601 = vmatmul.mubr.bf16.gmra.mrb[24].mxu1 %v219_v11  ;;  %v212_v18 = vmax.f32 %v192_v14, 0.0  ;;  %v195_v19 = vadd.f32 %v575_v17, %v500_v34  ;;  %v186_v20 = vpop.f32.mrb[15].mxu1 }
  0xf9   :  { %v210_v21 = vmax.f32 %v184_v16, 0.0  ;;  %v187_v22 = vadd.f32 %v500_v34, %v186_v20 }
  0xfa   :  { %v213_v23 = vmax.f32 %v195_v19, 0.0 }
  0xfb   :  { %v211_v24 = vmax.f32 %v187_v22, 0.0 }
  0xfc   :  { %v221_v25 = vpack.c.bf16 %v213_v23, %v212_v18 }
  0xfd   :  { %v220_v26 = vpack.c.bf16 %v211_v24, %v210_v21 }
  0xff   :  { %604 = vmatprep.mubr.bf16.mxu1 %v220_v26 }
 0x100   :  { %605 = vmatmul.mubr.bf16.gmra.mrb[28].mxu1 %v221_v25 }
 0x1bb   :  { %v594_v29 = vpop.f32.mrb[16].mxu1 }
 0x1bc   :  { %v336_v30 = vadd.f32 %v594_v29, %v511_v28  ;;  %v327_v31 = vpop.f32.mrb[17].mxu1 }
 0x1bd   :  { %v328_v32 = vadd.f32 %v511_v28, %v327_v31  ;;  %v595_v33 = vpop.f32.mrb[18].mxu1  ;;  %v416_v31 = vstv %s842_s6 }
 0x1be   :  { %v339_v34 = vadd.f32 %v595_v33, %v511_v28  ;;  %v330_v35 = vpop.f32.mrb[19].mxu1  ;;  %v392_v37 = vmax.f32 %v336_v30, 0.0  ;;  %v406_v30 = vld [vmem:[%s841_s5] sm:$0x1] }
 0x1bf   :  { %v331_v36 = vadd.f32 %v511_v28, %v330_v35  ;;  %v390_v39 = vmax.f32 %v328_v32, 0.0 }
 0x1c0   :  { %v393_v38 = vmax.f32 %v339_v34, 0.0 }
 0x1c1   :  { %v391_v40 = vmax.f32 %v331_v36, 0.0 }
 0x1c2   :  { %v408_v41 = vpack.c.bf16 %v393_v38, %v392_v37 }
 0x1c3   :  { %v598_v42 = vpop.f32.mrb[20].mxu1  ;;  %v407_v43 = vpack.c.bf16 %v391_v40, %v390_v39 }
 0x1c4   :  { %v352_v44 = vadd.f32 %v598_v42, %v511_v28  ;;  %v343_v45 = vpop.f32.mrb[21].mxu1  ;;  %v425_v61 = vsel %vm417_vm2, %v408_v41, 0 }
 0x1c5   :  { %v344_v46 = vadd.f32 %v511_v28, %v343_v45  ;;  %v599_v47 = vpop.f32.mrb[22].mxu1  ;;  %v422_v48 = vsel %vm417_vm2, %v407_v43, 0 }
 0x1c6   :  { %v396_v49 = vmax.f32 %v352_v44, 0.0  ;;  %v355_v50 = vadd.f32 %v599_v47, %v511_v28  ;;  %609 = vmatpush3.bf16.xpose.msra.mxu0 %v422_v48  ;;  %v346_v51 = vpop.f32.mrb[23].mxu1 }
 0x1c7   :  { %v394_v52 = vmax.f32 %v344_v46, 0.0  ;;  %v347_v53 = vadd.f32 %v511_v28, %v346_v51  ;;  %610 = vmatprep.subr.bf16.mxu0 %v665_v27 }
 0x1c8   :  { %v397_v54 = vmax.f32 %v355_v50, 0.0 }
 0x1c9   :  { %v395_v55 = vmax.f32 %v347_v53, 0.0 }
 0x1ca   :  { %v410_v56 = vpack.c.bf16 %v397_v54, %v396_v49 }
 0x1cb   :  { %v409_v57 = vpack.c.bf16 %v395_v55, %v394_v52  ;;  %v602_v58 = vpop.f32.mrb[24].mxu1 }
 0x1cc   :  { %v368_v59 = vadd.f32 %v602_v58, %v511_v28  ;;  %v359_v60 = vpop.f32.mrb[25].mxu1  ;;  %v431_v24 = vsel %vm417_vm2, %v410_v56, 0 }
 0x1cd   :  { %v360_v62 = vadd.f32 %v511_v28, %v359_v60  ;;  %v603_v63 = vpop.f32.mrb[26].mxu1  ;;  %v428_v12 = vsel %vm417_vm2, %v409_v57, 0 }
 0x1ce   :  { %611 = vmatpush3.bf16.xpose.msra.mxu0 %v425_v61  ;;  %v400_v0 = vmax.f32 %v368_v59, 0.0  ;;  %v371_v1 = vadd.f32 %v603_v63, %v511_v28  ;;  %v362_v2 = vpop.f32.mrb[27].mxu1 }
 0x1cf   :  { %v398_v3 = vmax.f32 %v360_v62, 0.0  ;;  %612 = vmatprep.subr.bf16.mxu0 %v665_v27  ;;  %v363_v4 = vadd.f32 %v511_v28, %v362_v2 }
 0x1d0   :  { %v401_v5 = vmax.f32 %v371_v1, 0.0 }
 0x1d1   :  { %v399_v6 = vmax.f32 %v363_v4, 0.0 }
 0x1d2   :  { %v412_v7 = vpack.c.bf16 %v401_v5, %v400_v0 }
 0x1d3   :  { %v411_v8 = vpack.c.bf16 %v399_v6, %v398_v3  ;;  %v606_v9 = vpop.f32.mrb[28].mxu1 }
 0x1d4   :  { %v384_v10 = vadd.f32 %v606_v9, %v511_v28  ;;  %v375_v11 = vpop.f32.mrb[29].mxu1  ;;  %v437_v26 = vsel %vm417_vm2, %v412_v7, 0 }
 0x1d5   :  { %v376_v13 = vadd.f32 %v511_v28, %v375_v11  ;;  %v607_v14 = vpop.f32.mrb[30].mxu1  ;;  %v434_v25 = vsel %vm417_vm2, %v411_v8, 0 }
 0x1d6   :  { %613 = vmatpush3.bf16.xpose.msra.mxu0 %v428_v12  ;;  %v404_v15 = vmax.f32 %v384_v10, 0.0  ;;  %v387_v16 = vadd.f32 %v607_v14, %v511_v28  ;;  %v378_v17 = vpop.f32.mrb[31].mxu1 }
 0x1d7   :  { %614 = vmatprep.subr.bf16.mxu0 %v665_v27  ;;  %v402_v18 = vmax.f32 %v376_v13, 0.0  ;;  %v379_v19 = vadd.f32 %v511_v28, %v378_v17 }
 0x1d8   :  { %v405_v20 = vmax.f32 %v387_v16, 0.0 }
 0x1d9   :  { %v403_v21 = vmax.f32 %v379_v19, 0.0 }
 0x1da   :  { %v414_v22 = vpack.c.bf16 %v405_v20, %v404_v15 }
 0x1db   :  { %v413_v23 = vpack.c.bf16 %v403_v21, %v402_v18 }
 0x1dc   :  { %v443_v29 = vsel %vm417_vm2, %v414_v22, 0 }
 0x1dd   :  { %v440_v28 = vsel %vm417_vm2, %v413_v23, 0 }
 0x1de   :  { %615 = vmatpush3.bf16.xpose.msra.mxu0 %v431_v24 }
 0x1df   :  { %616 = vmatprep.subr.bf16.mxu0 %v665_v27 }
 0x1e6   :  { %617 = vmatpush3.bf16.xpose.msra.mxu0 %v434_v25 }
 0x1e7   :  { %618 = vmatprep.subr.bf16.mxu0 %v665_v27 }
 0x1ee   :  { %619 = vmatpush3.bf16.xpose.msra.mxu0 %v437_v26 }
 0x1ef   :  { %620 = vmatprep.subr.bf16.mxu0 %v665_v27 }
 0x1f6   :  { %621 = vmatpush3.bf16.xpose.msra.mxu0 %v440_v28 }
 0x1f7   :  { %622 = vmatprep.subr.bf16.mxu0 %v665_v27 }
 0x1fe   :  { %623 = vmatpush3.bf16.xpose.msra.mxu0 %v443_v29 }
 0x205   :  { %625 = vmatmul.mubr.msk.bf16.vlgmr.msra.gmra.mrb[0].mxu0 %vm417_vm2, %v406_v30 }
 0x2d8   :  { %v479_v32 = vpop.f32.mrb[0].mxu0 }
 0x2d9   :  { %v480_v33 = vadd.f32 %v479_v32, %v416_v31  ;;  %v626_v34 = vpop.f32.mrb[1].mxu0 }
 0x2da   :  { %v482_v27 = vpop.f32.mrb[2].mxu0 }
 0x2db   :  { %485 = vst [vmem:[#allocation3] sm:$0x1] %v480_v33  ;;  %v627_v35 = vpop.f32.mrb[3].mxu0 }
 0x2dc   :  { %652 = shalt.err (!%p649_p4)
}
 0x2dd   :  { %s653_s6 = scalar_lea.hbm %s843_s7, 16 }
 0x2de   :  { %p654_p5 = scmp.ne.s32.totalorder %s843_s7, %s653_s6  ;;  %p657_p6 = scmp.lt.u32.totalorder %s653_s6, %s843_s7 }
 0x2e0   :  { %p659_p7 = pnand %p657_p6, %p654_p5 }
 0x2e2   :  { %662 = shalt.err (!%p659_p7)
}
 0x2e3   :  { %495 = dma.vmem_to_hbm [thread:$0]  %s493_s10, 16, %s843_s7, [#allocation4]  }
 0x2e4   :  { %663 = dma.done.wait [#allocation4], 16  }
 0x2e5   :  { %664 = vsyncadd [#allocation4], 4294967280 }
 0x2e6   :  { %499 = vsyncpa [#allocation4], 1 }

</bundles_post_ra>
